<compile_context>
chip_gen: v6e
topology: v6e:2x2x1
jax: 0.10.0
libtpu: 0.0.40
codegen_flags: <defaults>
</compile_context>

<pallas_src>
import functools

import jax
import jax.numpy as jnp
from jax import lax
from jax.experimental import pallas as pl
from jax.experimental.pallas import tpu as pltpu

_BATCH_BLOCK = 256  # batch-grid block size used only when batch is large


def _conditioning_kernel(idx_ref, wf_ref, w2_ref, out_ref, *, n_rows, total_cols):
    """Fused embedding gather (stacked one-hot) + bias-folded 2-layer MLP.

    idx_ref : (n_rows, Bblk, 1) int32 -- indices offset into the stacked
              category space; the last row is the constant bias index
              (== total_cols - 1), making the bias column always hot.
    wf_ref  : (total_cols, hidden+1) f32 -- blockdiag(tables) @ W1 with b1 as
              the bias row and a unit bias column (so h[:, hidden] == 1).
    w2_ref  : (hidden+1, E) f32 -- W2 with b2 appended as its last row.
    out_ref : (Bblk, E) f32
    """
    bblk = out_ref.shape[0]
    iota = lax.broadcasted_iota(jnp.int32, (bblk, total_cols), 1)
    # Stacked one-hot: n_vars ones per row plus the always-hot bias column.
    onehot = (idx_ref[0] == iota).astype(jnp.float32)
    for i in range(1, n_rows):
        onehot = onehot + (idx_ref[i] == iota).astype(jnp.float32)

    # h = relu(concat(emb) @ W1 + b1); the bias column yields h[:, hidden] = 1.
    h = jnp.maximum(
        jnp.dot(onehot, wf_ref[...], preferred_element_type=jnp.float32), 0.0)

    # out = h[:, :hidden] @ W2 + b2   (b2 is the last row of w2_ref)
    out_ref[...] = jnp.dot(h, w2_ref[...], preferred_element_type=jnp.float32)


def prepare_conditioning_params(tables, w1, b1, w2, b2):
    """One-time (init-time) weight preparation. Cache and reuse the result
    across forward calls -- this is NOT in the per-call hot path."""
    n_vars = len(tables)
    emb_dim = int(tables[0].shape[1])
    hidden = int(w1.shape[1])
    assert all(int(t.shape[1]) == emb_dim for t in tables), \
        "all embedding tables must share embedding_dim"
    assert int(w1.shape[0]) == n_vars * emb_dim, \
        "w1.shape[0] must equal n_vars * embedding_dim"
    assert w2.shape == (hidden, emb_dim) and b1.shape == (hidden,) and b2.shape == (emb_dim,)

    cat_dims = [int(t.shape[0]) for t in tables]
    total_cats = int(sum(cat_dims))

    # Pre-contract each table with its block of W1 (the concatenated embedding
    # is never an output, so this is mathematically identical to the original).
    blocks = [
        jnp.dot(tables[i].astype(jnp.float32),
                w1[i * emb_dim:(i + 1) * emb_dim, :].astype(jnp.float32),
                preferred_element_type=jnp.float32)
        for i in range(n_vars)
    ]
    w_fused = jnp.concatenate(blocks, axis=0)              # (total_cats, hidden)

    # Fold b1 (bias row) and add the unit bias column (feeds b2 folding).
    wf_aug = jnp.zeros((total_cats + 1, hidden + 1), jnp.float32)
    wf_aug = wf_aug.at[:total_cats, :hidden].set(w_fused)
    wf_aug = wf_aug.at[total_cats, :hidden].set(b1.astype(jnp.float32))
    wf_aug = wf_aug.at[total_cats, hidden].set(1.0)

    # Fold b2 as the last row of W2.
    w2_aug = jnp.concatenate(
        [w2.astype(jnp.float32), b2.astype(jnp.float32).reshape(1, emb_dim)],
        axis=0)                                             # (hidden+1, E)

    offsets = [0]
    for d in cat_dims[:-1]:
        offsets.append(offsets[-1] + d)
    offsets = jnp.asarray(offsets, dtype=jnp.int32)         # (n_vars,)

    return dict(wf_aug=wf_aug, w2_aug=w2_aug, offsets=offsets,
                total_cats=total_cats, emb_dim=emb_dim, n_vars=n_vars)


def _forward_impl(idx_stacked, *, wf_aug, w2_aug, offsets, total_cats, emb_dim):
    """idx_stacked: (n_vars, B) int32, one row per categorical variable, in the
    same order as the embedding tables used for prep."""
    n_vars, batch = idx_stacked.shape
    total_cols = wf_aug.shape[0]     # total_cats + 1
    hidden_p1 = wf_aug.shape[1]      # hidden + 1

    # Per-call index packing only: offset into stacked category space and append
    # the constant bias-index row.  Single small int32 operand -> one DMA.
    idx = idx_stacked.astype(jnp.int32) + offsets[:, None]
    bias_row = jnp.full((1, batch), total_cats, jnp.int32)
    idx_packed = jnp.concatenate([idx, bias_row], axis=0).reshape(
        n_vars + 1, batch, 1)

    kernel = functools.partial(_conditioning_kernel,
                               n_rows=n_vars + 1, total_cols=total_cols)

    flops = 2 * batch * total_cols * hidden_p1 + 2 * batch * hidden_p1 * emb_dim
    bytes_accessed = 4 * (idx_packed.size + wf_aug.size + w2_aug.size
                          + batch * emb_dim)
    cost = pl.CostEstimate(flops=flops, transcendentals=0,
                           bytes_accessed=bytes_accessed)

    if batch >= 2 * _BATCH_BLOCK and batch % _BATCH_BLOCK == 0:
        # Large batch: shard over batch blocks; "parallel" lets v7x use both TCs.
        grid = (batch // _BATCH_BLOCK,)
        return pl.pallas_call(
            kernel,
            out_shape=jax.ShapeDtypeStruct((batch, emb_dim), jnp.float32),
            grid=grid,
            in_specs=[
                pl.BlockSpec((n_vars + 1, _BATCH_BLOCK, 1), lambda i: (0, i, 0)),
                pl.BlockSpec((total_cols, hidden_p1), lambda i: (0, 0)),
                pl.BlockSpec((hidden_p1, emb_dim), lambda i: (0, 0)),
            ],
            out_specs=pl.BlockSpec((_BATCH_BLOCK, emb_dim), lambda i: (i, 0)),
            compiler_params=pltpu.CompilerParams(
                dimension_semantics=("parallel",)),
            cost_estimate=cost,
        )(idx_packed, wf_aug, w2_aug)

    # Small batch: gridless, everything whole-array resident in VMEM.
    vmem = pl.BlockSpec(memory_space=pltpu.MemorySpace.VMEM)
    return pl.pallas_call(
        kernel,
        out_shape=jax.ShapeDtypeStruct((batch, emb_dim), jnp.float32),
        in_specs=[vmem, vmem, vmem],
        out_specs=vmem,
        cost_estimate=cost,
    )(idx_packed, wf_aug, w2_aug)


def make_conditioning_forward(tables, w1, b1, w2, b2):
    """Mirrors ConditioningModule.__init__ (+weight prep) and returns a jitted
    forward: (n_vars, B) int32 indices -> (B, E) conditioning vectors."""
    params = prepare_conditioning_params(tables, w1, b1, w2, b2)
    fwd = functools.partial(_forward_impl,
                            wf_aug=params["wf_aug"], w2_aug=params["w2_aug"],
                            offsets=params["offsets"],
                            total_cats=params["total_cats"],
                            emb_dim=params["emb_dim"])
    return jax.jit(fwd)


def _reference_forward(indices, tables, w1, b1, w2, b2):
    # Direct (unfused) translation of the torch module's forward.
    embs = [tbl[idx] for idx, tbl in zip(indices, tables)]
    x = jnp.concatenate(embs, axis=1)
    h = jnp.maximum(x @ w1 + b1, 0.0)
    return h @ w2 + b2


if __name__ == "__main__":
    # Small deterministic setup consistent with the module:
    #   categorical_dims = {"a": 5, "b": 7, "c": 4}, embedding_dim = 32
    categorical_dims = {"a": 5, "b": 7, "c": 4}
    embedding_dim = 32
    hidden = 128
    batch = 8
    total_dim = len(categorical_dims) * embedding_dim

    key = jax.random.PRNGKey(0)
    keys = jax.random.split(key, 4 + len(categorical_dims))

    # Embedding tables ~ N(0, 1) (torch nn.Embedding default init).
    tables = [
        jax.random.normal(keys[i], (num_cat, embedding_dim), dtype=jnp.float32)
        for i, (name, num_cat) in enumerate(categorical_dims.items())
    ]

    # MLP params (stored as [in, out], i.e. transposed nn.Linear.weight).
    w1 = 0.05 * jax.random.normal(keys[-4], (total_dim, hidden), jnp.float32)
    b1 = 0.05 * jax.random.normal(keys[-3], (hidden,), jnp.float32)
    w2 = 0.05 * jax.random.normal(keys[-2], (hidden, embedding_dim), jnp.float32)
    b2 = 0.05 * jax.random.normal(keys[-1], (embedding_dim,), jnp.float32)

    # Categorical inputs (one integer index per sample per variable).
    idx_keys = jax.random.split(jax.random.PRNGKey(42), len(categorical_dims))
    indices = [
        jax.random.randint(idx_keys[i], (batch,), 0, num_cat, dtype=jnp.int32)
        for i, (name, num_cat) in enumerate(categorical_dims.items())
    ]
    idx_stacked = jnp.stack(indices, axis=0)  # (n_vars, B) int32

    # Init-time prep (cached) + per-call forward.
    forward = make_conditioning_forward(tables, w1, b1, w2, b2)
    out = jax.block_until_ready(forward(idx_stacked))

    ref = _reference_forward(indices, tables, w1, b1, w2, b2)
    assert out.shape == (batch, embedding_dim)
    assert jnp.allclose(out, ref, atol=1e-4, rtol=1e-4), "mismatch vs reference"

    # TODO(synk): initialize_statistics / update_running_statistics /
    # Mahalanobis / TensorBoard logging are stateful host-side utilities, not
    # part of forward(); not implemented as kernels.
    print("KERNEL_OK")
</pallas_src>

<mosaic_0001>
module attributes {stable_mosaic.version = 11 : i64} {
  func.func @_conditioning_kernel(%arg0: memref<4x8x1xi32, #tpu.memory_space<vmem>>, %arg1: memref<17x129xf32, #tpu.memory_space<vmem>>, %arg2: memref<129x32xf32, #tpu.memory_space<vmem>>, %arg3: memref<8x32xf32, #tpu.memory_space<vmem>>) attributes {dimension_semantics = [], scalar_prefetch = 0 : i64, scratch_operands = 0 : i64, tpu.core_type = #tpu.core_type<tc>} {
    %0 = tpu.iota {dimensions = array<i32: 1>} : vector<8x17xi32>
    %c0 = arith.constant 0 : index
    %c0_0 = arith.constant 0 : index
    %c0_1 = arith.constant 0 : index
    %1 = vector.load %arg0[%c0, %c0_0, %c0_1] : memref<4x8x1xi32, #tpu.memory_space<vmem>>, vector<1x8x1xi32>
    %2 = vector.shape_cast %1 : vector<1x8x1xi32> to vector<8x1xi32>
    %3 = vector.broadcast %2 : vector<8x1xi32> to vector<8x17xi32>
    %4 = arith.cmpi eq, %3, %0 : vector<8x17xi32>
    %5 = arith.extui %4 : vector<8x17xi1> to vector<8x17xi32>
    %6 = arith.sitofp %5 : vector<8x17xi32> to vector<8x17xf32>
    %c1 = arith.constant 1 : index
    %c0_2 = arith.constant 0 : index
    %c0_3 = arith.constant 0 : index
    %7 = vector.load %arg0[%c1, %c0_2, %c0_3] : memref<4x8x1xi32, #tpu.memory_space<vmem>>, vector<1x8x1xi32>
    %8 = vector.shape_cast %7 : vector<1x8x1xi32> to vector<8x1xi32>
    %9 = vector.broadcast %8 : vector<8x1xi32> to vector<8x17xi32>
    %10 = arith.cmpi eq, %9, %0 : vector<8x17xi32>
    %11 = arith.extui %10 : vector<8x17xi1> to vector<8x17xi32>
    %12 = arith.sitofp %11 : vector<8x17xi32> to vector<8x17xf32>
    %13 = arith.addf %6, %12 : vector<8x17xf32>
    %c2 = arith.constant 2 : index
    %c0_4 = arith.constant 0 : index
    %c0_5 = arith.constant 0 : index
    %14 = vector.load %arg0[%c2, %c0_4, %c0_5] : memref<4x8x1xi32, #tpu.memory_space<vmem>>, vector<1x8x1xi32>
    %15 = vector.shape_cast %14 : vector<1x8x1xi32> to vector<8x1xi32>
    %16 = vector.broadcast %15 : vector<8x1xi32> to vector<8x17xi32>
    %17 = arith.cmpi eq, %16, %0 : vector<8x17xi32>
    %18 = arith.extui %17 : vector<8x17xi1> to vector<8x17xi32>
    %19 = arith.sitofp %18 : vector<8x17xi32> to vector<8x17xf32>
    %20 = arith.addf %13, %19 : vector<8x17xf32>
    %c3 = arith.constant 3 : index
    %c0_6 = arith.constant 0 : index
    %c0_7 = arith.constant 0 : index
    %21 = vector.load %arg0[%c3, %c0_6, %c0_7] : memref<4x8x1xi32, #tpu.memory_space<vmem>>, vector<1x8x1xi32>
    %22 = vector.shape_cast %21 : vector<1x8x1xi32> to vector<8x1xi32>
    %23 = vector.broadcast %22 : vector<8x1xi32> to vector<8x17xi32>
    %24 = arith.cmpi eq, %23, %0 : vector<8x17xi32>
    %25 = arith.extui %24 : vector<8x17xi1> to vector<8x17xi32>
    %26 = arith.sitofp %25 : vector<8x17xi32> to vector<8x17xf32>
    %27 = arith.addf %20, %26 : vector<8x17xf32>
    %c0_8 = arith.constant 0 : index
    %c0_9 = arith.constant 0 : index
    %28 = vector.load %arg1[%c0_8, %c0_9] : memref<17x129xf32, #tpu.memory_space<vmem>>, vector<17x129xf32>
    %cst = arith.constant dense<0.000000e+00> : vector<8x129xf32>
    %29 = tpu.matmul %27, %28, %cst {dimension_numbers = #tpu.dot_dimension_numbers<[1], [0], [0], [1], [0, 0, 1, 1], [], []>} : vector<8x17xf32>, vector<17x129xf32>, vector<8x129xf32> -> vector<8x129xf32>
    %cst_10 = arith.constant 0.000000e+00 : f32
    %30 = vector.broadcast %cst_10 : f32 to vector<8x129xf32>
    %31 = arith.maximumf %29, %30 : vector<8x129xf32>
    %c0_11 = arith.constant 0 : index
    %c0_12 = arith.constant 0 : index
    %32 = vector.load %arg2[%c0_11, %c0_12] : memref<129x32xf32, #tpu.memory_space<vmem>>, vector<129x32xf32>
    %cst_13 = arith.constant dense<0.000000e+00> : vector<8x32xf32>
    %33 = tpu.matmul %31, %32, %cst_13 {dimension_numbers = #tpu.dot_dimension_numbers<[1], [0], [0], [1], [0, 0, 1, 1], [], []>} : vector<8x129xf32>, vector<129x32xf32>, vector<8x32xf32> -> vector<8x32xf32>
    %c0_14 = arith.constant 0 : index
    %c0_15 = arith.constant 0 : index
    %34 = vector.load %arg3[%c0_14, %c0_15] : memref<8x32xf32, #tpu.memory_space<vmem>>, vector<8x32xf32>
    tpu.vector_store %arg3[%c0_14, %c0_15], %33 {strides = array<i32>} : memref<8x32xf32, #tpu.memory_space<vmem>>, vector<8x32xf32>,
    return
  }
}

</mosaic_0001>

<bundles_post_ra>
// kernel: _forward_impl.1
= control target key start
LH: loop header
LB: loop body
LE: loop exit
PB: predicated region body
PF: predicated region fallthrough
CT: control target
= control target key end

     0   :  { %8 = vsyncpa [#allocation3], 0  ;;  %s417_s0 = inlined_call_operand.vmem [shape: s32[4,8,1], index: 0, kind: input, shape index: {}]   ;;  %s418_s1 = inlined_call_operand.vmem [shape: f32[17,129], index: 1, kind: input, shape index: {}]   ;;  %s419_s2 = inlined_call_operand.hbm [shape: f32[129,32], index: 2, kind: input, shape index: {}]   ;;  %s420_s3 = inlined_call_operand.hbm [shape: f32[8,32], index: 3, kind: output, shape index: {}]  }
   0x1   :  { %9 = vsyncpa [#allocation4], 0  ;;  %s330_s12 = smov [#allocation2]  }
   0x2   :  { %s19_s13 = sshll.u32 %s330_s12, 4  ;;  %s20_s13 = int_to_ptr.vmem [resolvable:$true] %s19_s13 }
   0x3   :  { %s294_s14 = scalar_lea.vmem %s20_s13, 2176  ;;  %p299_p1 = scmp.lt.s32.totalorder %s20_s13, %s20_s13 }
   0x4   :  { %p295_p0 = scmp.ne.s32.totalorder %s20_s13, %s294_s14  ;;  %p300_p2 = scmp.lt.s32.totalorder %s294_s14, %s294_s14 }
   0x6   :  { %p301_p3 = por %p300_p2, %p299_p1 }
   0x8   :  { %p302_p4 = pnand %p301_p3, %p295_p0 }
   0xa   :  { %305 = shalt.err (!%p302_p4)
}
   0xb   :  { %s331_s15 = smov 128   ;;  %s332_s16 = smov 8  }
   0xc   :  { %25 = dma.hbm_to_vmem [thread:$0]  %s419_s2, 2176, %s20_s13, [#allocation3], %s331_s15, %s331_s15, %s332_s16  }
   0xd   :  { %326 = dma.done.wait [#allocation3], 2176  }
   0xe   :  { %327 = vsyncadd [#allocation3], 4294965120  ;;  %v333_v0 = vmov 0   ;;  %v334_v1 = vmov 0.0   ;;  %v269_v2 = vld [vmem:[%s417_s0 + $0x10] sm:$0xff]  ;;  %v31_v3 = vld [vmem:[%s417_s0] sm:$0xff]  ;;  %v29_v26 = vlaneseq }
   0xf   :  { %285 = vset.pattern.permute.xlu1 %v333_v0  ;;  %284 = vset.pattern.permute.xlu0 %v333_v0  ;;  %v271_v4 = vld [vmem:[%s417_s0 + $0x18] sm:$0xff]  ;;  %v267_v5 = vld [vmem:[%s417_s0 + $0x8] sm:$0xff]  ;;  %vm75_vm0 = vcmask 1040384   ;;  %v69_v7 = vld [vmem:[%s418_s1 + $0x20] sm:$0x1]  ;;  %vm71_vm5 = vcmask 138240  }
  0x10   :  { %146 = vmatprep.mubr.f32.mxu0 %v334_v1  ;;  %179 = vmatprep.subr.mxu1 %v334_v1  ;;  %v70_v6 = vld [vmem:[%s418_s1 + $0x28] sm:$0x1]  ;;  %v68_v8 = vld [vmem:[%s418_s1 + $0x18] sm:$0xff]  ;;  %v67_v9 = vld [vmem:[%s418_s1 + $0x10] sm:$0xff]  ;;  %v30_v27 = vand.u32 127, %v29_v26  ;;  %vm172_vm6 = vcmask 7168  }
  0x11   :  { %50 = vperm.xlu1 %285, %v269_v2   ;;  %33 = vperm.xlu0 %284, %v31_v3   ;;  %v66_v10 = vld [vmem:[%s418_s1 + $0x8] sm:$0xff]  ;;  %v65_v11 = vld [vmem:[%s418_s1] sm:$0xff]  ;;  %v170_v12 = vld [vmem:[#allocation2 + $0x78] sm:$0xff]  ;;  %s335_s1 = smov [#allocation5]   ;;  %vm249_vm7 = vcmask 261120  }
  0x12   :  { %273 = vmatprep.subr.msk.mxu0 %vm75_vm0, %v70_v6  ;;  %v169_v13 = vld [vmem:[#allocation2 + $0x70] sm:$0xff]  ;;  %180 = vmatpush1.msra.mxu1 %v170_v12  ;;  %v168_v14 = vld [vmem:[#allocation2 + $0x68] sm:$0xff]  ;;  %v167_v15 = vld [vmem:[#allocation2 + $0x60] sm:$0xff]  ;;  %s257_s10 = sshll.u32 %s335_s1, 4  ;;  %s258_s10 = int_to_ptr.vmem [resolvable:$true] %s257_s10 }
  0x13   :  { %274 = vmatpush1.msk.msra.mxu0 %vm75_vm0, %v69_v7  ;;  %181 = vmatprep.subr.mxu1 %v334_v1  ;;  %v166_v16 = vld [vmem:[#allocation2 + $0x58] sm:$0xff]  ;;  %v165_v17 = vld [vmem:[#allocation2 + $0x50] sm:$0xff]  ;;  %v164_v18 = vld [vmem:[#allocation2 + $0x48] sm:$0xff]  ;;  %s306_s11 = scalar_lea.vmem %s258_s10, 128  ;;  %p311_p6 = scmp.lt.s32.totalorder %s258_s10, %s258_s10 }
  0x14   :  { %110 = vmatprep.subr.mxu0 %v68_v8  ;;  %182 = vmatpush1.msra.mxu1 %v169_v13  ;;  %v163_v19 = vld [vmem:[#allocation2 + $0x40] sm:$0xff]  ;;  %v162_v20 = vld [vmem:[#allocation2 + $0x38] sm:$0xff]  ;;  %v161_v21 = vld [vmem:[#allocation2 + $0x30] sm:$0xff]  ;;  %p307_p5 = scmp.ne.s32.totalorder %s258_s10, %s306_s11  ;;  %p312_p7 = scmp.lt.s32.totalorder %s306_s11, %s306_s11 }
  0x15   :  { %59 = vperm.xlu1 %285, %v271_v4   ;;  %41 = vperm.xlu0 %284, %v267_v5   ;;  %v160_v22 = vld [vmem:[#allocation2 + $0x28] sm:$0xff]  ;;  %v159_v23 = vld [vmem:[#allocation2 + $0x20] sm:$0xff]  ;;  %v158_v24 = vld [vmem:[#allocation2 + $0x18] sm:$0xff] }
  0x16   :  { %111 = vmatpush1.msra.mxu0 %v67_v9  ;;  %183 = vmatprep.subr.mxu1 %v334_v1  ;;  %v157_v25 = vld [vmem:[#allocation2 + $0x10] sm:$0xff]  ;;  %v156_v39 = vld [vmem:[#allocation2 + $0x8] sm:$0xff]  ;;  %v155_v40 = vld [vmem:[#allocation2] sm:$0xff]  ;;  %p313_p8 = por %p312_p7, %p311_p6 }
  0x17   :  { %112 = vmatprep.subr.mxu0 %v66_v10  ;;  %184 = vmatpush1.msra.mxu1 %v168_v14  ;;  %v171_v41 = vld [vmem:[#allocation2 + $0x80] sm:$0x1] }
  0x18   :  { %113 = vmatpush1.msra.mxu0 %v65_v11  ;;  %185 = vmatprep.subr.mxu1 %v334_v1  ;;  %p314_p9 = pnand %p313_p8, %p307_p5 }
  0x19   :  { %186 = vmatpush1.msra.mxu1 %v167_v15 }
  0x1a   :  { %187 = vmatprep.subr.mxu1 %v334_v1 }
  0x1b   :  { %188 = vmatpush1.msra.mxu1 %v166_v16 }
  0x1c   :  { %189 = vmatprep.subr.mxu1 %v334_v1 }
  0x1d   :  { %190 = vmatpush1.msra.mxu1 %v165_v17 }
  0x1e   :  { %191 = vmatprep.subr.mxu1 %v334_v1 }
  0x1f   :  { %192 = vmatpush1.msra.mxu1 %v164_v18 }
  0x20   :  { %193 = vmatprep.subr.mxu1 %v334_v1 }
  0x21   :  { %194 = vmatpush1.msra.mxu1 %v163_v19 }
  0x22   :  { %195 = vmatprep.subr.mxu1 %v334_v1 }
  0x23   :  { %196 = vmatpush1.msra.mxu1 %v162_v20 }
  0x24   :  { %197 = vmatprep.subr.mxu1 %v334_v1 }
  0x25   :  { %198 = vmatpush1.msra.mxu1 %v161_v21 }
  0x26   :  { %199 = vmatprep.subr.mxu1 %v334_v1 }
  0x27   :  { %200 = vmatpush1.msra.mxu1 %v160_v22 }
  0x28   :  { %201 = vmatprep.subr.mxu1 %v334_v1 }
  0x29   :  { %202 = vmatpush1.msra.mxu1 %v159_v23 }
  0x2a   :  { %203 = vmatprep.subr.mxu1 %v334_v1 }
  0x2b   :  { %204 = vmatpush1.msra.mxu1 %v158_v24 }
  0x2c   :  { %205 = vmatprep.subr.mxu1 %v334_v1 }
  0x2d   :  { %206 = vmatpush1.msra.mxu1 %v157_v25 }
  0x2e   :  { %207 = vmatprep.subr.mxu1 %v334_v1 }
  0x2f   :  { %208 = vmatpush1.msra.mxu1 %v156_v39 }
  0x30   :  { %209 = vmatprep.subr.mxu1 %v334_v1 }
  0x31   :  { %210 = vmatpush1.msra.mxu1 %v155_v40 }
  0x32   :  { %241 = vmatprep.subr.mxu1 %v334_v1 }
  0x33   :  { %276 = vmatpush2.msk.msra.mxu1 %vm75_vm0, %v171_v41 }
  0x8c   :  { %v51_v28 = vpop.permute.xlu1 %50  ;;  %v34_v29 = vpop.permute.xlu0 %33 }
  0x8d   :  { %vm35_vm1 = vcmp.eq.s32.totalorder %v34_v29, %v30_v27  ;;  %vm52_vm2 = vcmp.eq.s32.totalorder %v51_v28, %v30_v27 }
  0x8e   :  { %v266_v32 = vsel %vm35_vm1, 1.0, %v334_v1  ;;  %v270_v35 = vsel %vm52_vm2, 1.0, %v334_v1 }
  0x90   :  { %v60_v30 = vpop.permute.xlu1 %59  ;;  %v42_v31 = vpop.permute.xlu0 %41 }
  0x91   :  { %vm43_vm3 = vcmp.eq.s32.totalorder %v42_v31, %v30_v27  ;;  %vm61_vm4 = vcmp.eq.s32.totalorder %v60_v30, %v30_v27 }
  0x92   :  { %v268_v33 = vsel %vm43_vm3, 1.0, %v334_v1  ;;  %v272_v37 = vsel %vm61_vm4, 1.0, %v334_v1 }
  0x93   :  { %v46_v34 = vadd.f32 %v268_v33, %v266_v32 }
  0x95   :  { %v55_v36 = vadd.f32 %v270_v35, %v46_v34 }
  0x97   :  { %v64_v38 = vadd.f32 %v272_v37, %v55_v36 }
  0x99   :  { %275 = vmatmul.mubr.msk.f32.vlgmr.msra.gmra.mxu0 %vm71_vm5, %v64_v38 }
 0x159   :  { %v148_v42 = vpop.f32.mrf.mxu0 }
 0x15a   :  { %v153_v45 = vmax.f32 %v148_v42, 0.0 }
 0x15b   :  { %v150_v43 = vpop.f32.mrf.mxu0 }
 0x15c   :  { %v154_v44 = vmax.f32 %v150_v43, 0.0 }
 0x15e   :  { %277 = vmatprep.mubr.msk.f32.mxu1 %vm172_vm6, %v154_v44 }
 0x15f   :  { %244 = vmatmul.mubr.f32.vlgmr.msra.gmra.mxu1 %v153_v45 }
 0x21f   :  { %v245_v46 = vpop.f32.mrf.mxu1 }
 0x220   :  { %250 = vst.msk [vmem:[#allocation5] sm:$0xff] %vm249_vm7, %v245_v46 }
 0x221   :  { %v247_v47 = vpop.f32.mrf.mxu1 }
 0x222   :  { %317 = shalt.err (!%p314_p9)
}
 0x223   :  { %260 = dma.vmem_to_hbm [thread:$0]  %s258_s10, 128, %s420_s3, [#allocation4]  }
 0x224   :  { %328 = dma.done.wait [#allocation4], 128  }
 0x225   :  { %329 = vsyncadd [#allocation4], 4294967168 }
 0x226   :  { %264 = vsyncpa [#allocation3], 1 }
 0x227   :  { %265 = vsyncpa [#allocation4], 1 }

</bundles_post_ra>
